<compile_context>
chip_gen: v7x
topology: tpu7x:2x2x1
jax: 0.10.0
libtpu: 0.0.40
codegen_flags: <defaults>
</compile_context>

<pallas_src>
import functools

import jax
import jax.numpy as jnp
from jax.experimental import pallas as pl
from jax.experimental.pallas import tpu as pltpu

MSG_EPS = 1e-7   # GENConv message eps
BN_EPS = 1e-5    # BatchNorm1d eps
SM_EPS = 1e-16   # torch_geometric.utils.softmax denominator eps
LANE = 128       # TPU lane width (fc output padded to this)


def _softmax_aggregate(adj_bf16, h_src, h_dst):
    """GENConv softmax aggregation (t=1.0) + residual dst add, as one adjacency matmul."""
    # relu + eps on N rows instead of E edges (exact: one-hot gather commutes with elementwise).
    m = jnp.maximum(h_src, 0.0) + MSG_EPS                              # (N, C) f32, m >= eps
    # No max shift: m >= 0 so exp(m) never underflows for real neighbors, and only overflows
    # for m > ~88 (not reachable at these scales).  The num/den ratio is shift-invariant anyway.
    # TODO(synk): per-destination (segment) max shift for trained weights with huge activations.
    e = jnp.exp(m)                                                     # (N, C) f32, EUP
    # Fused numerator/denominator: one (N, 2C) bf16 operand, one MXU pass over adj.
    # NOTE: lane slices/concat at C=16 are intra-vreg (XLU + masked select); lane-dense only if
    # model hidden dims were padded to multiples of 128, which the spec fixes at 16.
    cat = jnp.concatenate([e * m, e], axis=-1).astype(jnp.bfloat16)    # (N, 2C) bf16
    agg = jnp.dot(adj_bf16, cat, preferred_element_type=jnp.float32)   # (N, 2C) f32 acc
    c = h_src.shape[-1]
    num = agg[:, :c]
    den = agg[:, c:] + SM_EPS
    return num * pl.reciprocal(den, approx=True) + h_dst


def _gen_mlp(y, w1_bf16, gamma, beta, w2_bf16):
    """GENConv MLP: Linear -> BatchNorm(batch stats) -> ReLU -> Linear (no biases)."""
    h = jnp.dot(y.astype(jnp.bfloat16), w1_bf16,
                preferred_element_type=jnp.float32)                    # (N, 2C) f32
    inv_n = 1.0 / h.shape[0]
    # Single-pass batch stats: var = E[h^2] - mu^2 (no (h - mu) temporary before the reduce).
    mu = jnp.sum(h, axis=0, keepdims=True) * inv_n
    ms = jnp.sum(h * h, axis=0, keepdims=True) * inv_n
    var = ms - mu * mu
    # gamma folded into the rsqrt scale: one (1, 2C) row op instead of a full-tile multiply.
    scale = gamma * jax.lax.rsqrt(var + BN_EPS)
    hn = jnp.maximum((h - mu) * scale + beta, 0.0)
    # TODO(synk): BatchNorm running-stats update (eval-mode stats) not modeled.
    return jnp.dot(hn.astype(jnp.bfloat16), w2_bf16,
                   preferred_element_type=jnp.float32)


def dropout_gcn_kernel(x_ref, adj_ref,
                       w1_ref, m1w1_ref, m1g_ref, m1b_ref, m1w2_ref,
                       m2w1_ref, m2g_ref, m2b_ref, m2w2_ref,
                       wfc_ref, bfc_ref, out_ref, *, hidden1):
    adj = adj_ref[...]                                                 # (N, N) bf16 edge counts

    # ---- conv1: GENConv(input_dim -> hidden1), fused src/dst projection x @ [Wsrc|Wdst] ----
    h = jnp.dot(x_ref[...], w1_ref[...], preferred_element_type=jnp.float32)   # (N, 2*H1) f32
    h_src1 = h[:, :hidden1]
    h_dst1 = h[:, hidden1:]
    y1 = _softmax_aggregate(adj, h_src1, h_dst1)
    o1 = _gen_mlp(y1, m1w1_ref[...], m1g_ref[...], m1b_ref[...], m1w2_ref[...])
    o1 = jnp.maximum(o1, 0.0)                                          # GCN inter-layer ReLU

    # ---- conv2: GENConv(hidden1 -> hidden2), in == out -> identity projections ----
    y2 = _softmax_aggregate(adj, o1, o1)
    o2 = _gen_mlp(y2, m2w1_ref[...], m2g_ref[...], m2b_ref[...], m2w2_ref[...])

    # ---- DropoutGCN head: ReLU -> fc (lane-dense, padded to 128 output lanes) ----
    o2 = jnp.maximum(o2, 0.0)
    out_ref[...] = (jnp.dot(o2.astype(jnp.bfloat16), wfc_ref[...],
                            preferred_element_type=jnp.float32)
                    + bfc_ref[...])


# ----------------------------- host-side (hoisted) glue --------------------------------------

def build_adjacency(edge_index, num_nodes):
    """Dense adjacency-count matrix A[d, s] = #edges s -> d. Built ONCE per graph.

    Counts are small integers -> exact in bf16; halves DMA bytes of the dominant operand.
    TODO(synk): for large graphs (N ~ 3-4K on v7x's 64 MiB VMEM, larger on v5e/v6e) replace the
    dense (N, N) adjacency with scalar-prefetch index gathers and a tiled grid: dst-node blocks
    as a leading 'parallel' axis (megacore on v7x), src-node blocks as a trailing 'arbitrary'
    reduction axis with an f32 VMEM accumulator, >= (512, 512) bf16 adjacency tiles, and a
    raised vmem_limit_bytes on v5e.  (The per-graph BatchNorm batch stats then need a second
    normalization pass.)
    """
    src, dst = edge_index[0], edge_index[1]
    return (jnp.zeros((num_nodes, num_nodes), jnp.float32)
            .at[dst, src].add(1.0)
            .astype(jnp.bfloat16))


def prepare_params(params):
    """One-time per-model prep: bf16 weight casts + lane-dense fc padding (128 output lanes)."""
    hidden2, out_dim = params["fc_w"].shape
    pad_out = max(LANE, -(-out_dim // LANE) * LANE)
    fc_w_p = (jnp.zeros((hidden2, pad_out), jnp.float32)
              .at[:, :out_dim].set(params["fc_w"]).astype(jnp.bfloat16))
    fc_b_p = jnp.zeros((1, pad_out), jnp.float32).at[:, :out_dim].set(params["fc_b"])
    bf16 = lambda a: a.astype(jnp.bfloat16)
    return {
        "w1": bf16(params["w1"]),
        "m1_w1": bf16(params["m1_w1"]), "m1_gamma": params["m1_gamma"],
        "m1_beta": params["m1_beta"], "m1_w2": bf16(params["m1_w2"]),
        "m2_w1": bf16(params["m2_w1"]), "m2_gamma": params["m2_gamma"],
        "m2_beta": params["m2_beta"], "m2_w2": bf16(params["m2_w2"]),
        "fc_w": fc_w_p, "fc_b": fc_b_p,
    }


@jax.jit
def dropout_gcn_apply(prep, x, adj):
    """Un-gridded single launch: every operand is one whole-array VMEM-resident block
    (no auto-pipeline, no double buffering)."""
    N = x.shape[0]
    hidden1 = prep["w1"].shape[1] // 2
    pad_out = prep["fc_w"].shape[1]

    args = (x.astype(jnp.bfloat16), adj,
            prep["w1"],
            prep["m1_w1"], prep["m1_gamma"], prep["m1_beta"], prep["m1_w2"],
            prep["m2_w1"], prep["m2_gamma"], prep["m2_beta"], prep["m2_w2"],
            prep["fc_w"], prep["fc_b"])

    vmem_spec = pl.BlockSpec(memory_space=pltpu.MemorySpace.VMEM)
    return pl.pallas_call(
        functools.partial(dropout_gcn_kernel, hidden1=hidden1),
        out_shape=jax.ShapeDtypeStruct((N, pad_out), jnp.float32),
        in_specs=[vmem_spec] * len(args),
        out_specs=vmem_spec,
    )(*args)


def dropout_gcn_forward(params, x, edge_index, node_mask):
    """Full forward: (hoistable) graph/model prep + kernel + dynamic-shape mask select."""
    adj = build_adjacency(edge_index, x.shape[0])       # cache per graph in real use
    prep = prepare_params(params)                       # cache per model in real use
    out_dim = params["fc_w"].shape[1]
    out_full = dropout_gcn_apply(prep, x, adj)
    out = out_full[:, :out_dim]
    # dynamic-shape boolean selection (x[node_mask != 0]) stays in host-side JAX
    return out[node_mask != 0]


def init_params(key, input_dim, hidden1, hidden2, output_dim):
    """Deterministic synthetic init (PyTorch-like 1/sqrt(fan_in) scaling), kept in f32."""
    ks = jax.random.split(key, 8)

    def lin(k, fan_in, fan_out):
        bound = 1.0 / jnp.sqrt(jnp.float32(fan_in))
        return jax.random.uniform(k, (fan_in, fan_out), jnp.float32, -bound, bound)

    exp1, exp2 = 2 * hidden1, 2 * hidden2
    return {
        # conv1 (GENConv input_dim -> hidden1): fused [W_src | W_dst]
        "w1": jnp.concatenate([lin(ks[0], input_dim, hidden1),
                               lin(ks[1], input_dim, hidden1)], axis=1),
        "m1_w1": lin(ks[2], hidden1, exp1),
        "m1_gamma": jnp.ones((1, exp1), jnp.float32),
        "m1_beta": jnp.zeros((1, exp1), jnp.float32),
        "m1_w2": lin(ks[3], exp1, hidden1),
        # conv2 (GENConv hidden1 -> hidden2, identity src/dst projections)
        "m2_w1": lin(ks[4], hidden2, exp2),
        "m2_gamma": jnp.ones((1, exp2), jnp.float32),
        "m2_beta": jnp.zeros((1, exp2), jnp.float32),
        "m2_w2": lin(ks[5], exp2, hidden2),
        # fc (nn.Linear hidden2 -> output_dim, with bias)
        "fc_w": lin(ks[6], hidden2, output_dim),
        "fc_b": jax.random.uniform(ks[7], (1, output_dim), jnp.float32,
                                   -1.0 / jnp.sqrt(jnp.float32(hidden2)),
                                   1.0 / jnp.sqrt(jnp.float32(hidden2))),
    }


if __name__ == "__main__":
    # small synthetic graph consistent with DropoutGCN(input_dim, output_dim, edge_dim, k, device)
    INPUT_DIM, OUTPUT_DIM = 8, 4
    HIDDEN1 = HIDDEN2 = 16
    NUM_NODES, NUM_EDGES = 32, 64
    # k, temperature, edge_feature_dim are unused in the forward pass (edge_attr=None).

    key = jax.random.PRNGKey(0)
    k_x, k_e, k_m, k_p = jax.random.split(key, 4)

    x = jax.random.normal(k_x, (NUM_NODES, INPUT_DIM), jnp.float32)
    edge_index = jax.random.randint(k_e, (2, NUM_EDGES), 0, NUM_NODES, jnp.int32)
    node_mask = jax.random.bernoulli(k_m, 0.7, (NUM_NODES,)).astype(jnp.int32)

    params = init_params(k_p, INPUT_DIM, HIDDEN1, HIDDEN2, OUTPUT_DIM)

    out = dropout_gcn_forward(params, x, edge_index, node_mask)
    jax.block_until_ready(out)
    assert out.shape == (int(jnp.sum(node_mask != 0)), OUTPUT_DIM)
    print("KERNEL_OK")
</pallas_src>

<mosaic_0001>
module attributes {stable_mosaic.version = 11 : i64} {
  func.func @dropout_gcn_kernel(%arg0: memref<32x8xbf16, #tpu.memory_space<vmem>>, %arg1: memref<32x32xbf16, #tpu.memory_space<vmem>>, %arg2: memref<8x32xbf16, #tpu.memory_space<vmem>>, %arg3: memref<16x32xbf16, #tpu.memory_space<vmem>>, %arg4: memref<1x32xf32, #tpu.memory_space<vmem>>, %arg5: memref<1x32xf32, #tpu.memory_space<vmem>>, %arg6: memref<32x16xbf16, #tpu.memory_space<vmem>>, %arg7: memref<16x32xbf16, #tpu.memory_space<vmem>>, %arg8: memref<1x32xf32, #tpu.memory_space<vmem>>, %arg9: memref<1x32xf32, #tpu.memory_space<vmem>>, %arg10: memref<32x16xbf16, #tpu.memory_space<vmem>>, %arg11: memref<16x128xbf16, #tpu.memory_space<vmem>>, %arg12: memref<1x128xf32, #tpu.memory_space<vmem>>, %arg13: memref<32x128xf32, #tpu.memory_space<vmem>>) attributes {dimension_semantics = [], scalar_prefetch = 0 : i64, scratch_operands = 0 : i64, tpu.core_type = #tpu.core_type<tc>} {
    %c0 = arith.constant 0 : index
    %c0_0 = arith.constant 0 : index
    %0 = vector.load %arg1[%c0, %c0_0] : memref<32x32xbf16, #tpu.memory_space<vmem>>, vector<32x32xbf16>
    %c0_1 = arith.constant 0 : index
    %c0_2 = arith.constant 0 : index
    %1 = vector.load %arg0[%c0_1, %c0_2] : memref<32x8xbf16, #tpu.memory_space<vmem>>, vector<32x8xbf16>
    %c0_3 = arith.constant 0 : index
    %c0_4 = arith.constant 0 : index
    %2 = vector.load %arg2[%c0_3, %c0_4] : memref<8x32xbf16, #tpu.memory_space<vmem>>, vector<8x32xbf16>
    %cst = arith.constant dense<0.000000e+00> : vector<32x32xf32>
    %3 = tpu.matmul %1, %2, %cst {dimension_numbers = #tpu.dot_dimension_numbers<[1], [0], [0], [1], [0, 0, 1, 1], [], []>} : vector<32x8xbf16>, vector<8x32xbf16>, vector<32x32xf32> -> vector<32x32xf32>
    %4 = vector.extract_strided_slice %3 {offsets = [0, 0], sizes = [32, 16], strides = [1, 1]} : vector<32x32xf32> to vector<32x16xf32>
    %5 = vector.extract_strided_slice %3 {offsets = [0, 16], sizes = [32, 16], strides = [1, 1]} : vector<32x32xf32> to vector<32x16xf32>
    %cst_5 = arith.constant 0.000000e+00 : f32
    %6 = vector.broadcast %cst_5 : f32 to vector<32x16xf32>
    %7 = arith.maximumf %4, %6 : vector<32x16xf32>
    %cst_6 = arith.constant 1.000000e-07 : f32
    %8 = vector.broadcast %cst_6 : f32 to vector<32x16xf32>
    %9 = arith.addf %7, %8 : vector<32x16xf32>
    %10 = math.exp %9 : vector<32x16xf32>
    %11 = arith.mulf %10, %9 : vector<32x16xf32>
    %12 = tpu.concatenate %11, %10 in 1 : vector<32x16xf32>, vector<32x16xf32> -> vector<32x32xf32>
    %13 = arith.truncf %12 : vector<32x32xf32> to vector<32x32xbf16>
    %cst_7 = arith.constant dense<0.000000e+00> : vector<32x32xf32>
    %14 = tpu.matmul %0, %13, %cst_7 {dimension_numbers = #tpu.dot_dimension_numbers<[1], [0], [0], [1], [0, 0, 1, 1], [], []>} : vector<32x32xbf16>, vector<32x32xbf16>, vector<32x32xf32> -> vector<32x32xf32>
    %15 = vector.extract_strided_slice %14 {offsets = [0, 0], sizes = [32, 16], strides = [1, 1]} : vector<32x32xf32> to vector<32x16xf32>
    %16 = vector.extract_strided_slice %14 {offsets = [0, 16], sizes = [32, 16], strides = [1, 1]} : vector<32x32xf32> to vector<32x16xf32>
    %cst_8 = arith.constant 1.000000e-16 : f32
    %17 = vector.broadcast %cst_8 : f32 to vector<32x16xf32>
    %18 = arith.addf %16, %17 : vector<32x16xf32>
    %19 = tpu.reciprocal %18 {approx = true} : vector<32x16xf32> -> vector<32x16xf32>
    %20 = arith.mulf %15, %19 : vector<32x16xf32>
    %21 = arith.addf %20, %5 : vector<32x16xf32>
    %c0_9 = arith.constant 0 : index
    %c0_10 = arith.constant 0 : index
    %22 = vector.load %arg3[%c0_9, %c0_10] : memref<16x32xbf16, #tpu.memory_space<vmem>>, vector<16x32xbf16>
    %c0_11 = arith.constant 0 : index
    %c0_12 = arith.constant 0 : index
    %23 = vector.load %arg4[%c0_11, %c0_12] : memref<1x32xf32, #tpu.memory_space<vmem>>, vector<1x32xf32>
    %c0_13 = arith.constant 0 : index
    %c0_14 = arith.constant 0 : index
    %24 = vector.load %arg5[%c0_13, %c0_14] : memref<1x32xf32, #tpu.memory_space<vmem>>, vector<1x32xf32>
    %c0_15 = arith.constant 0 : index
    %c0_16 = arith.constant 0 : index
    %25 = vector.load %arg6[%c0_15, %c0_16] : memref<32x16xbf16, #tpu.memory_space<vmem>>, vector<32x16xbf16>
    %26 = arith.truncf %21 : vector<32x16xf32> to vector<32x16xbf16>
    %cst_17 = arith.constant dense<0.000000e+00> : vector<32x32xf32>
    %27 = tpu.matmul %26, %22, %cst_17 {dimension_numbers = #tpu.dot_dimension_numbers<[1], [0], [0], [1], [0, 0, 1, 1], [], []>} : vector<32x16xbf16>, vector<16x32xbf16>, vector<32x32xf32> -> vector<32x32xf32>
    %cst_18 = arith.constant dense<0.000000e+00> : vector<32xf32>
    %28 = vector.multi_reduction <add>, %27, %cst_18 [0] : vector<32x32xf32> to vector<32xf32>
    %29 = vector.shape_cast %28 : vector<32xf32> to vector<1x32xf32>
    %cst_19 = arith.constant 3.125000e-02 : f32
    %30 = vector.broadcast %cst_19 : f32 to vector<1x32xf32>
    %31 = arith.mulf %29, %30 : vector<1x32xf32>
    %32 = arith.mulf %27, %27 : vector<32x32xf32>
    %cst_20 = arith.constant dense<0.000000e+00> : vector<32xf32>
    %33 = vector.multi_reduction <add>, %32, %cst_20 [0] : vector<32x32xf32> to vector<32xf32>
    %34 = vector.shape_cast %33 : vector<32xf32> to vector<1x32xf32>
    %cst_21 = arith.constant 3.125000e-02 : f32
    %35 = vector.broadcast %cst_21 : f32 to vector<1x32xf32>
    %36 = arith.mulf %34, %35 : vector<1x32xf32>
    %37 = arith.mulf %31, %31 : vector<1x32xf32>
    %38 = arith.subf %36, %37 : vector<1x32xf32>
    %cst_22 = arith.constant 9.99999974E-6 : f32
    %39 = vector.broadcast %cst_22 : f32 to vector<1x32xf32>
    %40 = arith.addf %38, %39 : vector<1x32xf32>
    %41 = math.rsqrt %40 : vector<1x32xf32>
    %42 = arith.mulf %23, %41 : vector<1x32xf32>
    %43 = vector.broadcast %31 : vector<1x32xf32> to vector<32x32xf32>
    %44 = arith.subf %27, %43 : vector<32x32xf32>
    %45 = vector.broadcast %42 : vector<1x32xf32> to vector<32x32xf32>
    %46 = arith.mulf %44, %45 : vector<32x32xf32>
    %47 = vector.broadcast %24 : vector<1x32xf32> to vector<32x32xf32>
    %48 = arith.addf %46, %47 : vector<32x32xf32>
    %cst_23 = arith.constant 0.000000e+00 : f32
    %49 = vector.broadcast %cst_23 : f32 to vector<32x32xf32>
    %50 = arith.maximumf %48, %49 : vector<32x32xf32>
    %51 = arith.truncf %50 : vector<32x32xf32> to vector<32x32xbf16>
    %cst_24 = arith.constant dense<0.000000e+00> : vector<32x16xf32>
    %52 = tpu.matmul %51, %25, %cst_24 {dimension_numbers = #tpu.dot_dimension_numbers<[1], [0], [0], [1], [0, 0, 1, 1], [], []>} : vector<32x32xbf16>, vector<32x16xbf16>, vector<32x16xf32> -> vector<32x16xf32>
    %cst_25 = arith.constant 0.000000e+00 : f32
    %53 = vector.broadcast %cst_25 : f32 to vector<32x16xf32>
    %54 = arith.maximumf %52, %53 : vector<32x16xf32>
    %cst_26 = arith.constant 0.000000e+00 : f32
    %55 = vector.broadcast %cst_26 : f32 to vector<32x16xf32>
    %56 = arith.maximumf %54, %55 : vector<32x16xf32>
    %cst_27 = arith.constant 1.000000e-07 : f32
    %57 = vector.broadcast %cst_27 : f32 to vector<32x16xf32>
    %58 = arith.addf %56, %57 : vector<32x16xf32>
    %59 = math.exp %58 : vector<32x16xf32>
    %60 = arith.mulf %59, %58 : vector<32x16xf32>
    %61 = tpu.concatenate %60, %59 in 1 : vector<32x16xf32>, vector<32x16xf32> -> vector<32x32xf32>
    %62 = arith.truncf %61 : vector<32x32xf32> to vector<32x32xbf16>
    %cst_28 = arith.constant dense<0.000000e+00> : vector<32x32xf32>
    %63 = tpu.matmul %0, %62, %cst_28 {dimension_numbers = #tpu.dot_dimension_numbers<[1], [0], [0], [1], [0, 0, 1, 1], [], []>} : vector<32x32xbf16>, vector<32x32xbf16>, vector<32x32xf32> -> vector<32x32xf32>
    %64 = vector.extract_strided_slice %63 {offsets = [0, 0], sizes = [32, 16], strides = [1, 1]} : vector<32x32xf32> to vector<32x16xf32>
    %65 = vector.extract_strided_slice %63 {offsets = [0, 16], sizes = [32, 16], strides = [1, 1]} : vector<32x32xf32> to vector<32x16xf32>
    %cst_29 = arith.constant 1.000000e-16 : f32
    %66 = vector.broadcast %cst_29 : f32 to vector<32x16xf32>
    %67 = arith.addf %65, %66 : vector<32x16xf32>
    %68 = tpu.reciprocal %67 {approx = true} : vector<32x16xf32> -> vector<32x16xf32>
    %69 = arith.mulf %64, %68 : vector<32x16xf32>
    %70 = arith.addf %69, %54 : vector<32x16xf32>
    %c0_30 = arith.constant 0 : index
    %c0_31 = arith.constant 0 : index
    %71 = vector.load %arg7[%c0_30, %c0_31] : memref<16x32xbf16, #tpu.memory_space<vmem>>, vector<16x32xbf16>
    %c0_32 = arith.constant 0 : index
    %c0_33 = arith.constant 0 : index
    %72 = vector.load %arg8[%c0_32, %c0_33] : memref<1x32xf32, #tpu.memory_space<vmem>>, vector<1x32xf32>
    %c0_34 = arith.constant 0 : index
    %c0_35 = arith.constant 0 : index
    %73 = vector.load %arg9[%c0_34, %c0_35] : memref<1x32xf32, #tpu.memory_space<vmem>>, vector<1x32xf32>
    %c0_36 = arith.constant 0 : index
    %c0_37 = arith.constant 0 : index
    %74 = vector.load %arg10[%c0_36, %c0_37] : memref<32x16xbf16, #tpu.memory_space<vmem>>, vector<32x16xbf16>
    %75 = arith.truncf %70 : vector<32x16xf32> to vector<32x16xbf16>
    %cst_38 = arith.constant dense<0.000000e+00> : vector<32x32xf32>
    %76 = tpu.matmul %75, %71, %cst_38 {dimension_numbers = #tpu.dot_dimension_numbers<[1], [0], [0], [1], [0, 0, 1, 1], [], []>} : vector<32x16xbf16>, vector<16x32xbf16>, vector<32x32xf32> -> vector<32x32xf32>
    %cst_39 = arith.constant dense<0.000000e+00> : vector<32xf32>
    %77 = vector.multi_reduction <add>, %76, %cst_39 [0] : vector<32x32xf32> to vector<32xf32>
    %78 = vector.shape_cast %77 : vector<32xf32> to vector<1x32xf32>
    %cst_40 = arith.constant 3.125000e-02 : f32
    %79 = vector.broadcast %cst_40 : f32 to vector<1x32xf32>
    %80 = arith.mulf %78, %79 : vector<1x32xf32>
    %81 = arith.mulf %76, %76 : vector<32x32xf32>
    %cst_41 = arith.constant dense<0.000000e+00> : vector<32xf32>
    %82 = vector.multi_reduction <add>, %81, %cst_41 [0] : vector<32x32xf32> to vector<32xf32>
    %83 = vector.shape_cast %82 : vector<32xf32> to vector<1x32xf32>
    %cst_42 = arith.constant 3.125000e-02 : f32
    %84 = vector.broadcast %cst_42 : f32 to vector<1x32xf32>
    %85 = arith.mulf %83, %84 : vector<1x32xf32>
    %86 = arith.mulf %80, %80 : vector<1x32xf32>
    %87 = arith.subf %85, %86 : vector<1x32xf32>
    %cst_43 = arith.constant 9.99999974E-6 : f32
    %88 = vector.broadcast %cst_43 : f32 to vector<1x32xf32>
    %89 = arith.addf %87, %88 : vector<1x32xf32>
    %90 = math.rsqrt %89 : vector<1x32xf32>
    %91 = arith.mulf %72, %90 : vector<1x32xf32>
    %92 = vector.broadcast %80 : vector<1x32xf32> to vector<32x32xf32>
    %93 = arith.subf %76, %92 : vector<32x32xf32>
    %94 = vector.broadcast %91 : vector<1x32xf32> to vector<32x32xf32>
    %95 = arith.mulf %93, %94 : vector<32x32xf32>
    %96 = vector.broadcast %73 : vector<1x32xf32> to vector<32x32xf32>
    %97 = arith.addf %95, %96 : vector<32x32xf32>
    %cst_44 = arith.constant 0.000000e+00 : f32
    %98 = vector.broadcast %cst_44 : f32 to vector<32x32xf32>
    %99 = arith.maximumf %97, %98 : vector<32x32xf32>
    %100 = arith.truncf %99 : vector<32x32xf32> to vector<32x32xbf16>
    %cst_45 = arith.constant dense<0.000000e+00> : vector<32x16xf32>
    %101 = tpu.matmul %100, %74, %cst_45 {dimension_numbers = #tpu.dot_dimension_numbers<[1], [0], [0], [1], [0, 0, 1, 1], [], []>} : vector<32x32xbf16>, vector<32x16xbf16>, vector<32x16xf32> -> vector<32x16xf32>
    %cst_46 = arith.constant 0.000000e+00 : f32
    %102 = vector.broadcast %cst_46 : f32 to vector<32x16xf32>
    %103 = arith.maximumf %101, %102 : vector<32x16xf32>
    %104 = arith.truncf %103 : vector<32x16xf32> to vector<32x16xbf16>
    %c0_47 = arith.constant 0 : index
    %c0_48 = arith.constant 0 : index
    %105 = vector.load %arg11[%c0_47, %c0_48] : memref<16x128xbf16, #tpu.memory_space<vmem>>, vector<16x128xbf16>
    %cst_49 = arith.constant dense<0.000000e+00> : vector<32x128xf32>
    %106 = tpu.matmul %104, %105, %cst_49 {dimension_numbers = #tpu.dot_dimension_numbers<[1], [0], [0], [1], [0, 0, 1, 1], [], []>} : vector<32x16xbf16>, vector<16x128xbf16>, vector<32x128xf32> -> vector<32x128xf32>
    %c0_50 = arith.constant 0 : index
    %c0_51 = arith.constant 0 : index
    %107 = vector.load %arg12[%c0_50, %c0_51] : memref<1x128xf32, #tpu.memory_space<vmem>>, vector<1x128xf32>
    %108 = vector.broadcast %107 : vector<1x128xf32> to vector<32x128xf32>
    %109 = arith.addf %106, %108 : vector<32x128xf32>
    %c0_52 = arith.constant 0 : index
    %c0_53 = arith.constant 0 : index
    %110 = vector.load %arg13[%c0_52, %c0_53] : memref<32x128xf32, #tpu.memory_space<vmem>>, vector<32x128xf32>
    tpu.vector_store %arg13[%c0_52, %c0_53], %109 {strides = array<i32>} : memref<32x128xf32, #tpu.memory_space<vmem>>, vector<32x128xf32>,
    return
  }
}

</mosaic_0001>

<bundles_post_ra>
// kernel: dropout_gcn_apply.1
= control target key start
LH: loop header
LB: loop body
LE: loop exit
PB: predicated region body
PF: predicated region fallthrough
CT: control target
= control target key end

     0   :  { %vm72_vm0 = vcmask 1043456   ;;  %vm65_vm1 = vcmask 64512   ;;  %s1369_s0 = inlined_call_operand.vmem [shape: bf16[32,8], index: 0, kind: input, shape index: {}]   ;;  %s1370_s1 = inlined_call_operand.vmem [shape: bf16[32,32], index: 1, kind: input, shape index: {}]   ;;  %s1371_s2 = inlined_call_operand.vmem [shape: bf16[8,32], index: 2, kind: input, shape index: {}]   ;;  %s1372_s3 = inlined_call_operand.vmem [shape: bf16[16,32], index: 3, kind: input, shape index: {}]   ;;  %s1373_s4 = inlined_call_operand.vmem [shape: f32[1,32], index: 4, kind: input, shape index: {}]   ;;  %s1374_s5 = inlined_call_operand.vmem [shape: f32[1,32], index: 5, kind: input, shape index: {}]   ;;  %s1375_s6 = inlined_call_operand.vmem [shape: bf16[32,16], index: 6, kind: input, shape index: {}]   ;;  %s1376_s7 = inlined_call_operand.vmem [shape: bf16[16,32], index: 7, kind: input, shape index: {}]   ;;  %s1377_s8 = inlined_call_operand.vmem [shape: f32[1,32], index: 8, kind: input, shape index: {}]   ;;  %s1378_s9 = inlined_call_operand.vmem [shape: f32[1,32], index: 9, kind: input, shape index: {}]   ;;  %s1379_s10 = inlined_call_operand.vmem [shape: bf16[32,16], index: 10, kind: input, shape index: {}]   ;;  %s1380_s11 = inlined_call_operand.vmem [shape: bf16[16,128], index: 11, kind: input, shape index: {}]   ;;  %s1381_s12 = inlined_call_operand.vmem [shape: f32[1,128], index: 12, kind: input, shape index: {}]   ;;  %s1382_s13 = inlined_call_operand.hbm [shape: f32[32,128], index: 13, kind: output, shape index: {}]  }
   0x1   :  { %v54_v0 = vld [vmem:[%s1371_s2] sm:$0xf]  ;;  %v1056_v3 = vld [vmem:[%s1369_s0 + $0x8] sm:$0xff]  }
   0x2   :  { %v1055_v1 = vld [vmem:[%s1369_s0] sm:$0xff]   ;;  %1029 = vmatprep.subr.msk.bf16.mxu0 %vm72_vm0, %v54_v0  ;;  %v74_v2 = vsel %vm72_vm0, %v54_v0, 0 }
   0x3   :  { %974 = vmatpush3.bf16.msra.mxu0 %v74_v2  ;;  %975 = vmatprep.mubr.msk.bf16.mxu0 %vm65_vm1, %v1055_v1 }
   0x6   :  { %976 = vmatmul.mubr.msk.bf16.vlgmr.msra.gmra.mrb[0].mxu0 %vm65_vm1, %v1056_v3 }
   0x7   :  { %18 = vsyncpa [#allocation3], 0  ;;  %s1126_s2 = smov 112   ;;  %v1220_v28 = vld [vmem:[%s1370_s1] sm:$0xff]   ;;  %vm178_vm2 = vcmask 261120   ;;  %s1127_s15 = smov 16  }
   0x8   :  { %983 = vmatprep.mubr.msk.bf16.mxu1 %vm178_vm2, %v1220_v28  ;;  %vm161_vm3 = vcmask 130048   ;;  %v1234_v43 = vld [vmem:[%s1370_s1 + $0x8] sm:$0xff]   ;;  %v1059_v52 = vld [vmem:[%s1372_s3] sm:$0xff]  }
   0x9   :  { %987 = vmatprep.subr.bf16.mxu0 %v1059_v52 }
   0xa   :  { %988 = vmatpush3.bf16.msra.mxu0 %v1059_v52 }
  0xd9   :  { %v1210_v4 = vpop.f32.mrb[0].mxu0 }
  0xda   :  { %v127_v5 = vmax.f32 %v1210_v4, 0.0  ;;  %v110_v6 = vpop.f32.mrb[1].mxu0 }
  0xdb   :  { %v125_v7 = vmax.f32 %v110_v6, 0.0  ;;  %v1213_v8 = vpop.f32.mrb[2].mxu0 }
  0xdc   :  { %v131_v9 = vadd.f32 1e-07, %v127_v5  ;;  %v128_v10 = vmax.f32 %v1213_v8, 0.0  ;;  %v113_v11 = vpop.f32.mrb[3].mxu0 }
  0xdd   :  { %v129_v12 = vadd.f32 1e-07, %v125_v7  ;;  %v126_v13 = vmax.f32 %v113_v11, 0.0  ;;  %268 = vrot.lane.b32.xlu1 %v113_v11, %s1126_s2 }
  0xde   :  { %v137_v14 = vmul.f32 1.442695, %v131_v9  ;;  %v132_v15 = vadd.f32 1e-07, %v128_v10 }
  0xdf   :  { %v133_v16 = vmul.f32 1.442695, %v129_v12  ;;  %v130_v17 = vadd.f32 1e-07, %v126_v13 }
  0xe0   :  { %1066 = vpow2.f32 %v137_v14  ;;  %v139_v18 = vmul.f32 1.442695, %v132_v15 }
  0xe1   :  { %1068 = vpow2.f32 %v133_v16  ;;  %v135_v19 = vmul.f32 1.442695, %v130_v17 }
  0xe2   :  { %1070 = vpow2.f32 %v139_v18 }
  0xe3   :  { %1072 = vpow2.f32 %v135_v19 }
  0xea   :  { %v1067_v20 = vpop.eup %1066 }
  0xeb   :  { %v1069_v21 = vpop.eup %1068  ;;  %v143_v22 = vmul.f32 %v1067_v20, %v131_v9 }
  0xec   :  { %v1071_v23 = vpop.eup %1070  ;;  %v141_v24 = vmul.f32 %v1069_v21, %v129_v12  ;;  %v1061_v12 = vld [vmem:[%s1375_s6 + $0x8] sm:$0xff]  }
  0xed   :  { %v1073_v25 = vpop.eup %1072  ;;  %v144_v26 = vmul.f32 %v1071_v23, %v132_v15  ;;  %v1040_v27 = vpack.i.bf16 %v1071_v23, %v1067_v20 }
  0xee   :  { %v142_v29 = vmul.f32 %v1073_v25, %v130_v17  ;;  %v1035_v30 = vpack.i.bf16 %v1073_v25, %v1069_v21 }
  0xf0   :  { %1036 = vrot.lane.b32.xlu0 %v1035_v30, %s1127_s15 }
  0xf4   :  { %1041 = vrot.lane.b32.xlu0 %v1040_v27, %s1127_s15 }
  0xf8   :  { %266 = vrot.lane.b32.xlu0 %v110_v6, %s1126_s2 }
 0x14f   :  { %v269_v57 = vpop.permute.xlu1 %268 }
 0x162   :  { %v1037_v31 = vpop.permute.xlu0 %1036 }
 0x163   :  { %v1039_v32 = vunpack.i.h.bf16 %v1037_v31  ;;  %v1038_v33 = vunpack.i.l.bf16 %v1037_v31 }
 0x165   :  { %v162_v34 = vsel %vm161_vm3, %v141_v24, %v1038_v33  ;;  %v163_v35 = vsel %vm161_vm3, %v142_v29, %v1039_v32 }
 0x166   :  { %v1042_v36 = vpop.permute.xlu0 %1041  ;;  %v166_v37 = vpack.c.bf16 %v163_v35, %v162_v34 }
 0x167   :  { %v1044_v38 = vunpack.i.h.bf16 %v1042_v36  ;;  %v1043_v39 = vunpack.i.l.bf16 %v1042_v36 }
 0x168   :  { %979 = vmatprep.subr.bf16.mxu1 %v166_v37 }
 0x169   :  { %980 = vmatpush3.bf16.msra.mxu1 %v166_v37  ;;  %v164_v40 = vsel %vm161_vm3, %v143_v22, %v1043_v39  ;;  %v165_v41 = vsel %vm161_vm3, %v144_v26, %v1044_v38 }
 0x16a   :  { %v167_v42 = vpack.c.bf16 %v165_v41, %v164_v40  ;;  %v267_v58 = vpop.permute.xlu0 %266 }
 0x16c   :  { %981 = vmatprep.subr.bf16.mxu1 %v167_v42 }
 0x16d   :  { %982 = vmatpush3.bf16.msra.mxu1 %v167_v42 }
 0x170   :  { %984 = vmatmul.mubr.msk.bf16.vlgmr.msra.gmra.mrb[0].mxu1 %vm178_vm2, %v1234_v43 }
 0x243   :  { %v985_v44 = vpop.f32.mrb[0].mxu1 }
 0x244   :  { %v236_v45 = vadd.f32 1e-16, %v985_v44  ;;  %v219_v46 = vpop.f32.mrb[1].mxu1 }
 0x245   :  { %v234_v47 = vadd.f32 1e-16, %v219_v46  ;;  %v986_v48 = vpop.f32.mrb[2].mxu1 }
 0x246   :  { %1074 = vrcp.f32 %v236_v45  ;;  %v222_v49 = vpop.f32.mrb[3].mxu1  ;;  %v237_v50 = vadd.f32 1e-16, %v986_v48 }
 0x247   :  { %1076 = vrcp.f32 %v234_v47  ;;  %v235_v51 = vadd.f32 1e-16, %v222_v49 }
 0x248   :  { %1078 = vrcp.f32 %v237_v50 }
 0x249   :  { %1080 = vrcp.f32 %v235_v51 }
 0x250   :  { %v1075_v53 = vpop.eup %1074 }
 0x251   :  { %v1077_v54 = vpop.eup %1076  ;;  %250 = vrot.lane.b32.xlu0 %v1075_v53, %s1126_s2 }
 0x252   :  { %246 = vrot.lane.b32.xlu1 %v1077_v54, %s1126_s2  ;;  %v1079_v55 = vpop.eup %1078 }
 0x253   :  { %v1081_v56 = vpop.eup %1080 }
 0x255   :  { %270 = vrot.lane.b32.xlu0 %v1210_v4, %s1126_s2 }
 0x256   :  { %252 = vrot.lane.b32.xlu1 %v1079_v55, %s1126_s2 }
 0x25a   :  { %248 = vrot.lane.b32.xlu1 %v1081_v56, %s1126_s2 }
 0x25e   :  { %272 = vrot.lane.b32.xlu1 %v1213_v8, %s1126_s2  ;;  %v1060_v8 = vld [vmem:[%s1375_s6] sm:$0xff]  }
 0x25f   :  { %993 = vmatprep.subr.bf16.mxu1 %v1060_v8 }
 0x260   :  { %994 = vmatpush3.bf16.msra.mxu1 %v1060_v8 }
 0x261   :  { %995 = vmatprep.subr.bf16.mxu1 %v1061_v12 }
 0x264   :  { %996 = vmatpush3.bf16.msra.mxu1 %v1061_v12 }
 0x2c3   :  { %v251_v60 = vpop.permute.xlu0 %250 }
 0x2c4   :  { %v247_v59 = vpop.permute.xlu1 %246  ;;  %v260_v2 = vmul.f32 %v985_v44, %v251_v60 }
 0x2c5   :  { %v258_v62 = vmul.f32 %v247_v59, %v219_v46  ;;  %v284_v59 = vld [vmem:[%s1373_s4] sm:$0x1] }
 0x2c7   :  { %v271_v1 = vpop.permute.xlu0 %270  ;;  %v278_v3 = vadd.f32 %v267_v58, %v258_v62 }
 0x2c8   :  { %v253_v61 = vpop.permute.xlu1 %252  ;;  %v280_v7 = vadd.f32 %v271_v1, %v260_v2 }
 0x2c9   :  { %v261_v4 = vmul.f32 %v986_v48, %v253_v61 }
 0x2cc   :  { %v249_v63 = vpop.permute.xlu1 %248 }
 0x2cd   :  { %v259_v0 = vmul.f32 %v249_v63, %v222_v49 }
 0x2cf   :  { %v279_v5 = vadd.f32 %v269_v57, %v259_v0  ;;  %v395_v57 = vlaneseq  ;;  %v926_v0 = vld [vmem:[%s1374_s5] ss:$0 sm:$0xff] }
 0x2d0   :  { %v273_v6 = vpop.permute.xlu1 %272 }
 0x2d1   :  { %v290_v9 = vpack.c.bf16 %v279_v5, %v278_v3  ;;  %v281_v10 = vadd.f32 %v273_v6, %v261_v4  ;;  %v1267_v58 = vshrl.u32 %v395_v57, 7 }
 0x2d3   :  { %v291_v11 = vpack.c.bf16 %v281_v10, %v280_v7  ;;  %989 = vmatprep.mubr.msk.bf16.mxu0 %vm161_vm3, %v290_v9  ;;  %v397_v60 = vsub.s32 0, %v1267_v58  ;;  %v1065_v58 = vld [vmem:[%s1380_s11] sm:$0xff]   ;;  %s1128_s11 = smov [#allocation2]  }
 0x2d4   :  { %s904_s14 = sshll.u32 %s1128_s11, 4  ;;  %s905_s14 = int_to_ptr.vmem [resolvable:$true] %s904_s14 }
 0x2d5   :  { %990 = vmatmul.mubr.msk.bf16.vlgmr.msra.gmra.mrb[4].mxu0 %vm161_vm3, %v291_v11  ;;  %p1107_p1 = scmp.lt.s32.totalorder %s905_s14, %s905_s14 }
 0x2d6   :  { %1005 = vmatprep.mubr.msk.bf16.mxu0 %vm178_vm2, %v1220_v28 }
 0x3a8   :  { %v991_v13 = vpop.f32.mrb[4].mxu0 }
 0x3a9   :  { %v338_v14 = vpop.f32.mrb[5].mxu0  ;;  %v369_v18 = vmul.f32 %v991_v13, %v991_v13  ;;  %v356_v23 = vsel %vm178_vm2, %v991_v13, 0.0 }
 0x3aa   :  { %v367_v15 = vmul.f32 %v338_v14, %v338_v14  ;;  %v992_v16 = vpop.f32.mrb[6].mxu0  ;;  %v353_v19 = vsel %vm178_vm2, %v338_v14, 0.0 }
 0x3ab   :  { %v341_v17 = vpop.f32.mrb[7].mxu0  ;;  %v370_v25 = vmul.f32 %v992_v16, %v992_v16  ;;  %v374_v29 = vsel %vm178_vm2, %v369_v18, 0.0  ;;  %v358_v30 = vsel %vm178_vm2, %v992_v16, 0.0 }
 0x3ac   :  { %v354_v20 = vsel %vm178_vm2, %v341_v17, 0.0  ;;  %v368_v21 = vmul.f32 %v341_v17, %v341_v17  ;;  %v371_v24 = vsel %vm178_vm2, %v367_v15, 0.0 }
 0x3ad   :  { %v355_v22 = vadd.f32 %v354_v20, %v353_v19  ;;  %v376_v33 = vsel %vm178_vm2, %v370_v25, 0.0 }
 0x3ae   :  { %v372_v26 = vsel %vm178_vm2, %v368_v21, 0.0 }
 0x3af   :  { %v357_v27 = vadd.f32 %v356_v23, %v355_v22  ;;  %v373_v28 = vadd.f32 %v372_v26, %v371_v24 }
 0x3b1   :  { %v359_v31 = vadd.f32 %v358_v30, %v357_v27  ;;  %v375_v32 = vadd.f32 %v374_v29, %v373_v28 }
 0x3b3   :  { %v360_v34 = vrot.slane %v359_v31, 4  ;;  %v377_v35 = vadd.f32 %v376_v33, %v375_v32 }
 0x3b5   :  { %v361_v36 = vadd.f32 %v360_v34, %v359_v31  ;;  %v378_v37 = vrot.slane %v377_v35, 4 }
 0x3b7   :  { %v362_v38 = vrot.slane %v361_v36, 2  ;;  %v379_v39 = vadd.f32 %v378_v37, %v377_v35 }
 0x3b9   :  { %v363_v40 = vadd.f32 %v362_v38, %v361_v36  ;;  %v380_v41 = vrot.slane %v379_v39, 2 }
 0x3bb   :  { %v364_v42 = vrot.slane %v363_v40, 1  ;;  %v381_v44 = vadd.f32 %v380_v41, %v379_v39 }
 0x3bd   :  { %v365_v45 = vadd.f32 %v364_v42, %v363_v40  ;;  %v382_v46 = vrot.slane %v381_v44, 1 }
 0x3bf   :  { %v366_v47 = vmul.f32 0.03125, %v365_v45  ;;  %v383_v48 = vadd.f32 %v382_v46, %v381_v44 }
 0x3c1   :  { %v384_v49 = vmul.f32 0.03125, %v383_v48  ;;  %v385_v50 = vmul.f32 %v366_v47, %v366_v47  ;;  %v391_v51 = vsub.f32 %v341_v17, %v366_v47  ;;  %v390_v52 = vsub.f32 %v338_v14, %v366_v47 }
 0x3c2   :  { %v392_v53 = vsub.f32 %v991_v13, %v366_v47  ;;  %v393_v54 = vsub.f32 %v992_v16, %v366_v47 }
 0x3c3   :  { %v386_v55 = vsub.f32 %v384_v49, %v385_v50 }
 0x3c5   :  { %v387_v56 = vadd.f32 1e-05, %v386_v55 }
 0x3c7   :  { %1082 = vrsqrt.f32 %v387_v56 }
 0x3d1   :  { %v1083_v61 = vpop.eup %1082 }
 0x3d2   :  { %v389_v62 = vmul.f32 %v1083_v61, %v284_v59 }
 0x3d4   :  { %v398_v63 = vrot.slane %v389_v62, %v397_v60 }
 0x3d6   :  { %v401_v1 = vmul.f32 %v398_v63, %v391_v51  ;;  %v400_v2 = vmul.f32 %v398_v63, %v390_v52  ;;  %v402_v3 = vmul.f32 %v398_v63, %v392_v53  ;;  %v403_v4 = vmul.f32 %v398_v63, %v393_v54 }
 0x3d8   :  { %v411_v5 = vadd.f32 %v926_v0, %v401_v1  ;;  %v410_v6 = vadd.f32 %v926_v0, %v400_v2  ;;  %v412_v7 = vadd.f32 %v926_v0, %v402_v3  ;;  %v413_v9 = vadd.f32 %v926_v0, %v403_v4  ;;  %v1062_v4 = vld [vmem:[%s1376_s7] sm:$0xff]  }
 0x3d9   :  { %1009 = vmatprep.subr.bf16.mxu1 %v1062_v4 }
 0x3da   :  { %v415_v10 = vmax.f32 %v411_v5, 0.0  ;;  %v414_v11 = vmax.f32 %v410_v6, 0.0  ;;  %v416_v8 = vmax.f32 %v412_v7, 0.0  ;;  %v417_v12 = vmax.f32 %v413_v9, 0.0 }
 0x3dc   :  { %v418_v13 = vpack.c.bf16 %v415_v10, %v414_v11  ;;  %v419_v14 = vpack.c.bf16 %v417_v12, %v416_v8 }
 0x3de   :  { %997 = vmatprep.mubr.msk.bf16.mxu1 %vm178_vm2, %v418_v13 }
 0x3df   :  { %998 = vmatmul.mubr.msk.bf16.vlgmr.msra.gmra.mrb[4].mxu1 %vm178_vm2, %v419_v14 }
 0x3e0   :  { %1010 = vmatpush3.bf16.msra.mxu1 %v1062_v4 }
 0x3e1   :  { %1023 = vmatprep.subr.bf16.mxu1 %v1065_v58 }
 0x4b2   :  { %v1280_v15 = vpop.f32.mrb[4].mxu1 }
 0x4b3   :  { %v489_v16 = vmax.f32 %v1280_v15, 0.0  ;;  %v1283_v17 = vpop.f32.mrb[5].mxu1 }
 0x4b4   :  { %v487_v18 = vmax.f32 %v1283_v17, 0.0  ;;  %v1286_v19 = vpop.f32.mrb[6].mxu1  ;;  %v1063_v17 = vld [vmem:[%s1379_s10] sm:$0xff]  }
 0x4b5   :  { %v493_v20 = vmax.f32 %v489_v16, 0.0  ;;  %v490_v21 = vmax.f32 %v1286_v19, 0.0  ;;  %v1291_v22 = vpop.f32.mrb[7].mxu1 }
 0x4b6   :  { %v491_v23 = vmax.f32 %v487_v18, 0.0  ;;  %v488_v24 = vmax.f32 %v1291_v22, 0.0 }
 0x4b7   :  { %v497_v25 = vadd.f32 1e-07, %v493_v20  ;;  %v494_v26 = vmax.f32 %v490_v21, 0.0 }
 0x4b8   :  { %v495_v27 = vadd.f32 1e-07, %v491_v23  ;;  %v492_v28 = vmax.f32 %v488_v24, 0.0 }
 0x4b9   :  { %v503_v29 = vmul.f32 1.442695, %v497_v25  ;;  %v498_v30 = vadd.f32 1e-07, %v494_v26 }
 0x4ba   :  { %v499_v31 = vmul.f32 1.442695, %v495_v27  ;;  %v496_v32 = vadd.f32 1e-07, %v492_v28 }
 0x4bb   :  { %1084 = vpow2.f32 %v503_v29  ;;  %v505_v33 = vmul.f32 1.442695, %v498_v30 }
 0x4bc   :  { %1086 = vpow2.f32 %v499_v31  ;;  %v501_v34 = vmul.f32 1.442695, %v496_v32 }
 0x4bd   :  { %1088 = vpow2.f32 %v505_v33 }
 0x4be   :  { %1090 = vpow2.f32 %v501_v34 }
 0x4c5   :  { %v1085_v35 = vpop.eup %1084 }
 0x4c6   :  { %v1087_v36 = vpop.eup %1086  ;;  %v509_v37 = vmul.f32 %v1085_v35, %v497_v25 }
 0x4c7   :  { %v1089_v38 = vpop.eup %1088  ;;  %v507_v39 = vmul.f32 %v1087_v36, %v495_v27 }
 0x4c8   :  { %v1091_v40 = vpop.eup %1090  ;;  %v510_v41 = vmul.f32 %v1089_v38, %v498_v30  ;;  %v1050_v42 = vpack.i.bf16 %v1089_v38, %v1085_v35 }
 0x4c9   :  { %v508_v44 = vmul.f32 %v1091_v40, %v496_v32  ;;  %v1045_v45 = vpack.i.bf16 %v1091_v40, %v1087_v36 }
 0x4ca   :  { %1051 = vrot.lane.b32.xlu1 %v1050_v42, %s1127_s15 }
 0x4cb   :  { %1046 = vrot.lane.b32.xlu0 %v1045_v45, %s1127_s15  ;;  %s1102_s15 = scalar_lea.vmem %s905_s14, 512 }
 0x4cc   :  { %p1103_p0 = scmp.ne.s32.totalorder %s905_s14, %s1102_s15  ;;  %p1108_p2 = scmp.lt.s32.totalorder %s1102_s15, %s1102_s15 }
 0x4ce   :  { %p1109_p3 = por %p1108_p2, %p1107_p1 }
 0x4d0   :  { %p1110_p4 = pnand %p1109_p3, %p1103_p0 }
 0x53c   :  { %v1052_v46 = vpop.permute.xlu1 %1051 }
 0x53d   :  { %v1054_v47 = vunpack.i.h.bf16 %v1052_v46  ;;  %v1053_v48 = vunpack.i.l.bf16 %v1052_v46  ;;  %v1047_v49 = vpop.permute.xlu0 %1046 }
 0x53e   :  { %v1049_v50 = vunpack.i.h.bf16 %v1047_v49  ;;  %v1048_v51 = vunpack.i.l.bf16 %v1047_v49 }
 0x53f   :  { %v529_v52 = vsel %vm161_vm3, %v509_v37, %v1053_v48  ;;  %v530_v53 = vsel %vm161_vm3, %v510_v41, %v1054_v47 }
 0x540   :  { %v527_v54 = vsel %vm161_vm3, %v507_v39, %v1048_v51  ;;  %v528_v55 = vsel %vm161_vm3, %v508_v44, %v1049_v50  ;;  %v532_v56 = vpack.c.bf16 %v530_v53, %v529_v52 }
 0x541   :  { %v531_v57 = vpack.c.bf16 %v528_v55, %v527_v54 }
 0x543   :  { %1001 = vmatprep.subr.bf16.mxu0 %v531_v57 }
 0x544   :  { %1002 = vmatpush3.bf16.msra.mxu0 %v531_v57 }
 0x545   :  { %1003 = vmatprep.subr.bf16.mxu0 %v532_v56 }
 0x548   :  { %1004 = vmatpush3.bf16.msra.mxu0 %v532_v56 }
 0x549   :  { %1015 = vmatprep.subr.bf16.mxu0 %v1063_v17 }
 0x54b   :  { %1006 = vmatmul.mubr.msk.bf16.vlgmr.msra.gmra.mrb[8].mxu0 %vm178_vm2, %v1234_v43 }
 0x54c   :  { %1016 = vmatpush3.bf16.msra.mxu0 %v1063_v17 }
 0x61e   :  { %v1007_v59 = vpop.f32.mrb[8].mxu0 }
 0x61f   :  { %v567_v61 = vpop.f32.mrb[9].mxu0  ;;  %v584_v1 = vadd.f32 1e-16, %v1007_v59 }
 0x620   :  { %v582_v62 = vadd.f32 1e-16, %v567_v61  ;;  %v1008_v63 = vpop.f32.mrb[10].mxu0 }
 0x621   :  { %v570_v0 = vpop.f32.mrb[11].mxu0  ;;  %v585_v3 = vadd.f32 1e-16, %v1008_v63 }
 0x622   :  { %1092 = vrcp.f32 %v582_v62  ;;  %v583_v2 = vadd.f32 1e-16, %v570_v0 }
 0x624   :  { %1094 = vrcp.f32 %v583_v2 }
 0x625   :  { %1096 = vrcp.f32 %v584_v1 }
 0x626   :  { %1098 = vrcp.f32 %v585_v3 }
 0x62c   :  { %v1093_v5 = vpop.eup %1092 }
 0x62d   :  { %594 = vrot.lane.b32.xlu0 %v1093_v5, %s1126_s2 }
 0x62e   :  { %v1095_v43 = vpop.eup %1094 }
 0x62f   :  { %596 = vrot.lane.b32.xlu1 %v1095_v43, %s1126_s2  ;;  %v1097_v6 = vpop.eup %1096  ;;  %v616_v43 = vld [vmem:[%s1377_s8] sm:$0x1] }
 0x630   :  { %v1099_v7 = vpop.eup %1098 }
 0x631   :  { %598 = vrot.lane.b32.xlu0 %v1097_v6, %s1126_s2 }
 0x633   :  { %600 = vrot.lane.b32.xlu1 %v1099_v7, %s1126_s2 }
 0x69f   :  { %v595_v9 = vpop.permute.xlu0 %594 }
 0x6a0   :  { %v606_v10 = vmul.f32 %v595_v9, %v567_v61 }
 0x6a1   :  { %v597_v11 = vpop.permute.xlu1 %596 }
 0x6a2   :  { %v607_v8 = vmul.f32 %v597_v11, %v570_v0  ;;  %v610_v13 = vadd.f32 %v606_v10, %v487_v18  ;;  %v1064_v18 = vld [vmem:[%s1379_s10 + $0x8] sm:$0xff]   ;;  %v936_v10 = vld [vmem:[%s1378_s9] ss:$0 sm:$0xff] }
 0x6a3   :  { %v599_v12 = vpop.permute.xlu0 %598  ;;  %1017 = vmatprep.subr.bf16.mxu0 %v1064_v18 }
 0x6a4   :  { %v611_v14 = vadd.f32 %v607_v8, %v488_v24  ;;  %v608_v20 = vmul.f32 %v1007_v59, %v599_v12  ;;  %1018 = vmatpush3.bf16.msra.mxu0 %v1064_v18 }
 0x6a5   :  { %v601_v23 = vpop.permute.xlu1 %600 }
 0x6a6   :  { %v622_v25 = vpack.c.bf16 %v611_v14, %v610_v13  ;;  %v609_v26 = vmul.f32 %v1008_v63, %v601_v23  ;;  %v612_v27 = vadd.f32 %v608_v20, %v489_v16 }
 0x6a8   :  { %v613_v28 = vadd.f32 %v609_v26, %v490_v21  ;;  %1011 = vmatprep.mubr.msk.bf16.mxu1 %vm161_vm3, %v622_v25 }
 0x6aa   :  { %v623_v29 = vpack.c.bf16 %v613_v28, %v612_v27 }
 0x6ac   :  { %1012 = vmatmul.mubr.msk.bf16.vlgmr.msra.gmra.mrb[8].mxu1 %vm161_vm3, %v623_v29 }
 0x6ad   :  { %1024 = vmatpush3.bf16.msra.mxu1 %v1065_v58 }
 0x77f   :  { %v1013_v15 = vpop.f32.mrb[8].mxu1 }
 0x780   :  { %v670_v16 = vpop.f32.mrb[9].mxu1  ;;  %v701_v24 = vmul.f32 %v1013_v15, %v1013_v15  ;;  %v688_v34 = vsel %vm178_vm2, %v1013_v15, 0.0 }
 0x781   :  { %v699_v19 = vmul.f32 %v670_v16, %v670_v16  ;;  %v1014_v21 = vpop.f32.mrb[10].mxu1  ;;  %v685_v30 = vsel %vm178_vm2, %v670_v16, 0.0 }
 0x782   :  { %v673_v22 = vpop.f32.mrb[11].mxu1  ;;  %v702_v36 = vmul.f32 %v1014_v21, %v1014_v21  ;;  %v706_v40 = vsel %vm178_vm2, %v701_v24, 0.0  ;;  %v690_v41 = vsel %vm178_vm2, %v1014_v21, 0.0 }
 0x783   :  { %v686_v31 = vsel %vm178_vm2, %v673_v22, 0.0  ;;  %v700_v32 = vmul.f32 %v673_v22, %v673_v22  ;;  %v703_v35 = vsel %vm178_vm2, %v699_v19, 0.0 }
 0x784   :  { %v687_v33 = vadd.f32 %v686_v31, %v685_v30  ;;  %v708_v45 = vsel %vm178_vm2, %v702_v36, 0.0 }
 0x785   :  { %v704_v37 = vsel %vm178_vm2, %v700_v32, 0.0 }
 0x786   :  { %v689_v38 = vadd.f32 %v688_v34, %v687_v33  ;;  %v705_v39 = vadd.f32 %v704_v37, %v703_v35  ;;  %v941_v33 = vld [vmem:[%s1381_s12] ss:$0 sm:$0xff] }
 0x788   :  { %v691_v42 = vadd.f32 %v690_v41, %v689_v38  ;;  %v707_v44 = vadd.f32 %v706_v40, %v705_v39 }
 0x78a   :  { %v692_v46 = vrot.slane %v691_v42, 4  ;;  %v709_v47 = vadd.f32 %v708_v45, %v707_v44 }
 0x78c   :  { %v693_v48 = vadd.f32 %v692_v46, %v691_v42  ;;  %v710_v49 = vrot.slane %v709_v47, 4 }
 0x78e   :  { %v694_v50 = vrot.slane %v693_v48, 2  ;;  %v711_v51 = vadd.f32 %v710_v49, %v709_v47 }
 0x790   :  { %v695_v52 = vadd.f32 %v694_v50, %v693_v48  ;;  %v712_v53 = vrot.slane %v711_v51, 2 }
 0x792   :  { %v696_v54 = vrot.slane %v695_v52, 1  ;;  %v713_v55 = vadd.f32 %v712_v53, %v711_v51 }
 0x794   :  { %v697_v56 = vadd.f32 %v696_v54, %v695_v52  ;;  %v714_v57 = vrot.slane %v713_v55, 1 }
 0x796   :  { %v698_v59 = vmul.f32 0.03125, %v697_v56  ;;  %v715_v61 = vadd.f32 %v714_v57, %v713_v55 }
 0x798   :  { %v716_v62 = vmul.f32 0.03125, %v715_v61  ;;  %v717_v63 = vmul.f32 %v698_v59, %v698_v59  ;;  %v723_v0 = vsub.f32 %v673_v22, %v698_v59  ;;  %v722_v1 = vsub.f32 %v670_v16, %v698_v59 }
 0x799   :  { %v724_v2 = vsub.f32 %v1013_v15, %v698_v59  ;;  %v725_v3 = vsub.f32 %v1014_v21, %v698_v59 }
 0x79a   :  { %v718_v4 = vsub.f32 %v716_v62, %v717_v63 }
 0x79c   :  { %v719_v5 = vadd.f32 1e-05, %v718_v4 }
 0x79e   :  { %1100 = vrsqrt.f32 %v719_v5 }
 0x7a8   :  { %v1101_v6 = vpop.eup %1100 }
 0x7a9   :  { %v721_v7 = vmul.f32 %v1101_v6, %v616_v43 }
 0x7ab   :  { %v730_v9 = vrot.slane %v721_v7, %v397_v60 }
 0x7ad   :  { %v733_v11 = vmul.f32 %v730_v9, %v723_v0  ;;  %v732_v8 = vmul.f32 %v730_v9, %v722_v1  ;;  %v734_v12 = vmul.f32 %v730_v9, %v724_v2  ;;  %v735_v13 = vmul.f32 %v730_v9, %v725_v3 }
 0x7af   :  { %v743_v14 = vadd.f32 %v936_v10, %v733_v11  ;;  %v742_v20 = vadd.f32 %v936_v10, %v732_v8  ;;  %v744_v23 = vadd.f32 %v936_v10, %v734_v12  ;;  %v745_v25 = vadd.f32 %v936_v10, %v735_v13 }
 0x7b1   :  { %v747_v26 = vmax.f32 %v743_v14, 0.0  ;;  %v746_v27 = vmax.f32 %v742_v20, 0.0  ;;  %v748_v28 = vmax.f32 %v744_v23, 0.0  ;;  %v749_v29 = vmax.f32 %v745_v25, 0.0 }
 0x7b3   :  { %v750_v17 = vpack.c.bf16 %v747_v26, %v746_v27  ;;  %v751_v18 = vpack.c.bf16 %v749_v29, %v748_v28 }
 0x7b5   :  { %1019 = vmatprep.mubr.msk.bf16.mxu0 %vm178_vm2, %v750_v17 }
 0x7b6   :  { %1020 = vmatmul.mubr.msk.bf16.vlgmr.msra.gmra.mrb[12].mxu0 %vm178_vm2, %v751_v18 }
 0x889   :  { %v1021_v60 = vpop.f32.mrb[12].mxu0 }
 0x88a   :  { %v804_v15 = vpop.f32.mrb[13].mxu0  ;;  %v821_v19 = vmax.f32 %v1021_v60, 0.0 }
 0x88b   :  { %v1022_v16 = vpop.f32.mrb[14].mxu0  ;;  %v819_v24 = vmax.f32 %v804_v15, 0.0 }
 0x88c   :  { %v822_v21 = vmax.f32 %v1022_v16, 0.0  ;;  %v807_v22 = vpop.f32.mrb[15].mxu0 }
 0x88d   :  { %v820_v30 = vmax.f32 %v807_v22, 0.0 }
 0x88e   :  { %v824_v31 = vpack.c.bf16 %v822_v21, %v821_v19 }
 0x88f   :  { %v823_v32 = vpack.c.bf16 %v820_v30, %v819_v24 }
 0x891   :  { %1025 = vmatprep.mubr.msk.bf16.mxu1 %vm161_vm3, %v823_v32 }
 0x892   :  { %1026 = vmatmul.mubr.msk.bf16.vlgmr.msra.gmra.mrb[12].mxu1 %vm161_vm3, %v824_v31 }
 0x965   :  { %v1027_v34 = vpop.f32.mrb[12].mxu1 }
 0x966   :  { %v889_v35 = vadd.f32 %v1027_v34, %v941_v33  ;;  %v880_v36 = vpop.f32.mrb[13].mxu1 }
 0x967   :  { %v881_v37 = vadd.f32 %v941_v33, %v880_v36  ;;  %v1028_v38 = vpop.f32.mrb[14].mxu1 }
 0x968   :  { %897 = vst [vmem:[#allocation2 + $0x10] sm:$0xff] %v889_v35  ;;  %v892_v39 = vadd.f32 %v1028_v38, %v941_v33  ;;  %v883_v40 = vpop.f32.mrb[15].mxu1 }
 0x969   :  { %895 = vst [vmem:[#allocation2] sm:$0xff] %v881_v37  ;;  %v884_v41 = vadd.f32 %v941_v33, %v883_v40 }
 0x96a   :  { %898 = vst [vmem:[#allocation2 + $0x18] sm:$0xff] %v892_v39 }
 0x96b   :  { %896 = vst [vmem:[#allocation2 + $0x8] sm:$0xff] %v884_v41 }
 0x96c   :  { %1113 = shalt.err (!%p1110_p4)
}
 0x96d   :  { %s1114_s17 = scalar_lea.hbm %s1382_s13, 512 }
 0x96e   :  { %p1115_p5 = scmp.ne.s32.totalorder %s1382_s13, %s1114_s17  ;;  %p1118_p6 = scmp.lt.u32.totalorder %s1114_s17, %s1382_s13 }
 0x970   :  { %p1120_p7 = pnand %p1118_p6, %p1115_p5 }
 0x972   :  { %1123 = shalt.err (!%p1120_p7)
}
 0x973   :  { %s1129_s20 = smov 128   ;;  %s1130_s21 = smov 8  }
 0x974   :  { %910 = dma.vmem_to_hbm [thread:$0]  %s905_s14, 512, %s1382_s13, [#allocation3], %s1129_s20, %s1129_s20, %s1130_s21  }
 0x975   :  { %1124 = dma.done.wait [#allocation3], 512  }
 0x976   :  { %1125 = vsyncadd [#allocation3], 4294966784 }
 0x977   :  { %914 = vsyncpa [#allocation3], 1 }

</bundles_post_ra>
